<compile_context>
chip_gen: v7x
topology: tpu7x:2x2x1
jax: 0.10.0
libtpu: 0.0.40
codegen_flags: <defaults>
</compile_context>

<pallas_src>
import jax
import jax.numpy as jnp
from jax import lax
from jax.experimental import pallas as pl
from jax.experimental.pallas import tpu as pltpu

HIDDEN = 70
H_PAD = 72           # next multiple of 8 above 70 (sublane alignment only)
CHUNK = 8            # hidden rows per inner-loop step (one sublane group)
N_CHUNKS = H_PAD // CHUNK


def mlp_kernel(x_ref, w1_ref, b1_ref, w2_ref, b2_ref, o_ref):
    # x_ref                : (1, TILE_B)  VMEM -- batch on the lane axis
    # w1_ref/b1_ref/w2_ref : (H_PAD, 1)   VMEM -- hidden on the sublane axis
    # b2_ref               : (1, 1)       SMEM -- scalar bias
    x = x_ref[...]                                        # (1, TILE_B)
    tile_b = x.shape[1]

    def body(c, acc):
        r = pl.multiple_of(c * CHUNK, CHUNK)
        w1c = w1_ref[pl.ds(r, CHUNK), :]                  # (CHUNK, 1)
        b1c = b1_ref[pl.ds(r, CHUNK), :]                  # (CHUNK, 1)
        w2c = w2_ref[pl.ds(r, CHUNK), :]                  # (CHUNK, 1)
        # Layer 1 (K=1): VPU broadcast multiply-add.
        pre = w1c * x + b1c                               # (CHUNK, TILE_B)
        # Sigmoid via a single EUP tanh: sigmoid(z) = 0.5*tanh(z/2) + 0.5.
        h = 0.5 * jnp.tanh(0.5 * pre) + 0.5               # (CHUNK, TILE_B)
        # Layer 2 (N=1): weighted partial sums; padded rows have w2c == 0.
        return acc + w2c * h

    acc = lax.fori_loop(0, N_CHUNKS, body,
                        jnp.zeros((CHUNK, tile_b), jnp.float32),
                        unroll=True)
    # Single sublane (XLU) reduction at the end.
    y = jnp.sum(acc, axis=0, keepdims=True)               # (1, TILE_B)
    o_ref[...] = y + b2_ref[0, 0]                         # scalar bias from SMEM


def prepare_params(w1, b1, w2, b2):
    """Pad PyTorch-shaped params to the kernel layout ONCE (hoisted out of the
    per-call path; reuse the result across forward calls).

    w1: (70, 1), b1: (70,), w2: (1, 70), b2: (1,)
    returns (w1_col, b1_col, w2_col, b2_s) with hidden on sublanes, zero-padded
    70 -> 72, plus a (1, 1) SMEM scalar bias.
    """
    w1_col = jnp.zeros((H_PAD, 1), jnp.float32).at[:HIDDEN, 0].set(
        w1[:, 0].astype(jnp.float32))
    b1_col = jnp.zeros((H_PAD, 1), jnp.float32).at[:HIDDEN, 0].set(
        b1.astype(jnp.float32))
    w2_col = jnp.zeros((H_PAD, 1), jnp.float32).at[:HIDDEN, 0].set(
        w2[0, :].astype(jnp.float32))
    b2_s = jnp.asarray(b2, jnp.float32).reshape(1, 1)
    return w1_col, b1_col, w2_col, b2_s


def _pick_tile_b(B):
    # Lane-dense tiles (multiples of 128).  Keep >= 2 tiles whenever B > 128 so
    # v7x's two TensorCores both get work on the "parallel" axis; grow the tile
    # only once B is large enough to amortize the ~0.35us per grid step.
    if B <= 2048:
        return 128
    if B <= 8192:
        return 256
    return 512


def neural_network_forward(x, padded_params, *, tile_b=None):
    """Forward matching PyTorch: sigmoid(x @ W1^T + b1) @ W2^T + b2.

    x             : (B, 1) float32
    padded_params : output of prepare_params()
    returns (B, 1) float32
    """
    w1_col, b1_col, w2_col, b2_s = padded_params
    B = x.shape[0]
    if tile_b is None:
        tile_b = _pick_tile_b(B)
    n_tiles = pl.cdiv(B, tile_b)
    b_pad = n_tiles * tile_b

    # Batch on the lane axis, zero-padded to a multiple of tile_b.
    x_row = jnp.zeros((1, b_pad), jnp.float32).at[0, :B].set(
        x[:, 0].astype(jnp.float32))

    out = pl.pallas_call(
        mlp_kernel,
        out_shape=jax.ShapeDtypeStruct((1, b_pad), jnp.float32),
        grid=(n_tiles,),
        in_specs=[
            pl.BlockSpec((1, tile_b), lambda i: (0, i)),        # x batch tile
            pl.BlockSpec((H_PAD, 1), lambda i: (0, 0)),         # w1 resident
            pl.BlockSpec((H_PAD, 1), lambda i: (0, 0)),         # b1 resident
            pl.BlockSpec((H_PAD, 1), lambda i: (0, 0)),         # w2 resident
            pl.BlockSpec(memory_space=pltpu.MemorySpace.SMEM),  # b2 scalar
        ],
        out_specs=pl.BlockSpec((1, tile_b), lambda i: (0, i)),
        compiler_params=pltpu.CompilerParams(
            dimension_semantics=("parallel",),
        ),
    )(x_row, w1_col, b1_col, w2_col, b2_s)

    return out[0, :B].reshape(B, 1)


def init_params(key):
    # Deterministic init mimicking nn.Linear's uniform(-1/sqrt(fan_in), 1/sqrt(fan_in)),
    # stored in PyTorch-native shapes.
    k1, k2, k3, k4 = jax.random.split(key, 4)
    bound1 = 1.0                      # fan_in = 1
    bound2 = 1.0 / jnp.sqrt(70.0)     # fan_in = 70
    w1 = jax.random.uniform(k1, (HIDDEN, 1), jnp.float32, -bound1, bound1)
    b1 = jax.random.uniform(k2, (HIDDEN,), jnp.float32, -bound1, bound1)
    w2 = jax.random.uniform(k3, (1, HIDDEN), jnp.float32, -bound2, bound2)
    b2 = jax.random.uniform(k4, (1,), jnp.float32, -bound2, bound2)
    return w1, b1, w2, b2


if __name__ == "__main__":
    key = jax.random.PRNGKey(0)
    k_x, k_p = jax.random.split(key)

    B = 8
    x = jax.random.normal(k_x, (B, 1), jnp.float32)
    w1, b1, w2, b2 = init_params(k_p)

    padded = prepare_params(w1, b1, w2, b2)   # padded once, reused across calls
    y = neural_network_forward(x, padded)
    y = jax.block_until_ready(y)

    # Pure-JAX reference with PyTorch semantics: sigmoid(x @ W1^T + b1) @ W2^T + b2.
    h_ref = 1.0 / (1.0 + jnp.exp(-(x @ w1.T + b1)))
    y_ref = h_ref @ w2.T + b2
    assert y.shape == (B, 1)
    assert jnp.allclose(y, y_ref, atol=1e-5, rtol=1e-5), float(
        jnp.max(jnp.abs(y - y_ref))
    )

    print("KERNEL_OK")
</pallas_src>

<mosaic_0001>
module attributes {stable_mosaic.version = 11 : i64} {
  func.func @mlp_kernel(%arg0: i32, %arg1: memref<1x128xf32, #tpu.memory_space<vmem>>, %arg2: memref<72x1xf32, #tpu.memory_space<vmem>>, %arg3: memref<72x1xf32, #tpu.memory_space<vmem>>, %arg4: memref<72x1xf32, #tpu.memory_space<vmem>>, %arg5: memref<1x1xf32, #tpu.memory_space<smem>>, %arg6: memref<1x128xf32, #tpu.memory_space<vmem>>) attributes {dimension_semantics = [#tpu.dimension_semantics<parallel>], iteration_bounds = array<i64: 1>, scalar_prefetch = 0 : i64, scratch_operands = 0 : i64, tpu.core_type = #tpu.core_type<tc>, window_params = [{transform_indices = @transform_0, window_bounds = array<i64: 1, 128>}, {pipeline_mode = #tpu.pipeline_mode<synchronous>, transform_indices = @transform_1, window_bounds = array<i64: 72, 1>}, {pipeline_mode = #tpu.pipeline_mode<synchronous>, transform_indices = @transform_2, window_bounds = array<i64: 72, 1>}, {pipeline_mode = #tpu.pipeline_mode<synchronous>, transform_indices = @transform_3, window_bounds = array<i64: 72, 1>}, {transform_indices = @transform_4, window_bounds = array<i64: 1, 1>}, {transform_indices = @transform_5, window_bounds = array<i64: 1, 128>}]} {
    %c0 = arith.constant 0 : index
    %c0_0 = arith.constant 0 : index
    %0 = vector.load %arg1[%c0, %c0_0] : memref<1x128xf32, #tpu.memory_space<vmem>>, vector<1x128xf32>
    %cst = arith.constant 0.000000e+00 : f32
    %1 = vector.broadcast %cst : f32 to vector<8x128xf32>
    %c0_i32 = arith.constant 0 : i32
    %c8_i32 = arith.constant 8 : i32
    %2 = arith.muli %c0_i32, %c8_i32 : i32
    %3 = tpu.assume_multiple %2, 8 : i32
    %4 = arith.index_cast %3 : i32 to index
    %c0_1 = arith.constant 0 : index
    %5 = vector.load %arg2[%4, %c0_1] : memref<72x1xf32, #tpu.memory_space<vmem>>, vector<8x1xf32>
    %6 = arith.index_cast %3 : i32 to index
    %c0_2 = arith.constant 0 : index
    %7 = vector.load %arg3[%6, %c0_2] : memref<72x1xf32, #tpu.memory_space<vmem>>, vector<8x1xf32>
    %8 = arith.index_cast %3 : i32 to index
    %c0_3 = arith.constant 0 : index
    %9 = vector.load %arg4[%8, %c0_3] : memref<72x1xf32, #tpu.memory_space<vmem>>, vector<8x1xf32>
    %10 = vector.broadcast %5 : vector<8x1xf32> to vector<8x128xf32>
    %11 = vector.broadcast %0 : vector<1x128xf32> to vector<8x128xf32>
    %12 = arith.mulf %10, %11 : vector<8x128xf32>
    %13 = vector.broadcast %7 : vector<8x1xf32> to vector<8x128xf32>
    %14 = arith.addf %12, %13 : vector<8x128xf32>
    %cst_4 = arith.constant 5.000000e-01 : f32
    %15 = vector.broadcast %cst_4 : f32 to vector<8x128xf32>
    %16 = arith.mulf %15, %14 : vector<8x128xf32>
    %17 = math.tanh %16 : vector<8x128xf32>
    %cst_5 = arith.constant 5.000000e-01 : f32
    %18 = vector.broadcast %cst_5 : f32 to vector<8x128xf32>
    %19 = arith.mulf %18, %17 : vector<8x128xf32>
    %cst_6 = arith.constant 5.000000e-01 : f32
    %20 = vector.broadcast %cst_6 : f32 to vector<8x128xf32>
    %21 = arith.addf %19, %20 : vector<8x128xf32>
    %22 = vector.broadcast %9 : vector<8x1xf32> to vector<8x128xf32>
    %23 = arith.mulf %22, %21 : vector<8x128xf32>
    %24 = arith.addf %1, %23 : vector<8x128xf32>
    %c1_i32 = arith.constant 1 : i32
    %c8_i32_7 = arith.constant 8 : i32
    %25 = arith.muli %c1_i32, %c8_i32_7 : i32
    %26 = tpu.assume_multiple %25, 8 : i32
    %27 = arith.index_cast %26 : i32 to index
    %c0_8 = arith.constant 0 : index
    %28 = vector.load %arg2[%27, %c0_8] : memref<72x1xf32, #tpu.memory_space<vmem>>, vector<8x1xf32>
    %29 = arith.index_cast %26 : i32 to index
    %c0_9 = arith.constant 0 : index
    %30 = vector.load %arg3[%29, %c0_9] : memref<72x1xf32, #tpu.memory_space<vmem>>, vector<8x1xf32>
    %31 = arith.index_cast %26 : i32 to index
    %c0_10 = arith.constant 0 : index
    %32 = vector.load %arg4[%31, %c0_10] : memref<72x1xf32, #tpu.memory_space<vmem>>, vector<8x1xf32>
    %33 = vector.broadcast %28 : vector<8x1xf32> to vector<8x128xf32>
    %34 = vector.broadcast %0 : vector<1x128xf32> to vector<8x128xf32>
    %35 = arith.mulf %33, %34 : vector<8x128xf32>
    %36 = vector.broadcast %30 : vector<8x1xf32> to vector<8x128xf32>
    %37 = arith.addf %35, %36 : vector<8x128xf32>
    %cst_11 = arith.constant 5.000000e-01 : f32
    %38 = vector.broadcast %cst_11 : f32 to vector<8x128xf32>
    %39 = arith.mulf %38, %37 : vector<8x128xf32>
    %40 = math.tanh %39 : vector<8x128xf32>
    %cst_12 = arith.constant 5.000000e-01 : f32
    %41 = vector.broadcast %cst_12 : f32 to vector<8x128xf32>
    %42 = arith.mulf %41, %40 : vector<8x128xf32>
    %cst_13 = arith.constant 5.000000e-01 : f32
    %43 = vector.broadcast %cst_13 : f32 to vector<8x128xf32>
    %44 = arith.addf %42, %43 : vector<8x128xf32>
    %45 = vector.broadcast %32 : vector<8x1xf32> to vector<8x128xf32>
    %46 = arith.mulf %45, %44 : vector<8x128xf32>
    %47 = arith.addf %24, %46 : vector<8x128xf32>
    %c2_i32 = arith.constant 2 : i32
    %c8_i32_14 = arith.constant 8 : i32
    %48 = arith.muli %c2_i32, %c8_i32_14 : i32
    %49 = tpu.assume_multiple %48, 8 : i32
    %50 = arith.index_cast %49 : i32 to index
    %c0_15 = arith.constant 0 : index
    %51 = vector.load %arg2[%50, %c0_15] : memref<72x1xf32, #tpu.memory_space<vmem>>, vector<8x1xf32>
    %52 = arith.index_cast %49 : i32 to index
    %c0_16 = arith.constant 0 : index
    %53 = vector.load %arg3[%52, %c0_16] : memref<72x1xf32, #tpu.memory_space<vmem>>, vector<8x1xf32>
    %54 = arith.index_cast %49 : i32 to index
    %c0_17 = arith.constant 0 : index
    %55 = vector.load %arg4[%54, %c0_17] : memref<72x1xf32, #tpu.memory_space<vmem>>, vector<8x1xf32>
    %56 = vector.broadcast %51 : vector<8x1xf32> to vector<8x128xf32>
    %57 = vector.broadcast %0 : vector<1x128xf32> to vector<8x128xf32>
    %58 = arith.mulf %56, %57 : vector<8x128xf32>
    %59 = vector.broadcast %53 : vector<8x1xf32> to vector<8x128xf32>
    %60 = arith.addf %58, %59 : vector<8x128xf32>
    %cst_18 = arith.constant 5.000000e-01 : f32
    %61 = vector.broadcast %cst_18 : f32 to vector<8x128xf32>
    %62 = arith.mulf %61, %60 : vector<8x128xf32>
    %63 = math.tanh %62 : vector<8x128xf32>
    %cst_19 = arith.constant 5.000000e-01 : f32
    %64 = vector.broadcast %cst_19 : f32 to vector<8x128xf32>
    %65 = arith.mulf %64, %63 : vector<8x128xf32>
    %cst_20 = arith.constant 5.000000e-01 : f32
    %66 = vector.broadcast %cst_20 : f32 to vector<8x128xf32>
    %67 = arith.addf %65, %66 : vector<8x128xf32>
    %68 = vector.broadcast %55 : vector<8x1xf32> to vector<8x128xf32>
    %69 = arith.mulf %68, %67 : vector<8x128xf32>
    %70 = arith.addf %47, %69 : vector<8x128xf32>
    %c3_i32 = arith.constant 3 : i32
    %c8_i32_21 = arith.constant 8 : i32
    %71 = arith.muli %c3_i32, %c8_i32_21 : i32
    %72 = tpu.assume_multiple %71, 8 : i32
    %73 = arith.index_cast %72 : i32 to index
    %c0_22 = arith.constant 0 : index
    %74 = vector.load %arg2[%73, %c0_22] : memref<72x1xf32, #tpu.memory_space<vmem>>, vector<8x1xf32>
    %75 = arith.index_cast %72 : i32 to index
    %c0_23 = arith.constant 0 : index
    %76 = vector.load %arg3[%75, %c0_23] : memref<72x1xf32, #tpu.memory_space<vmem>>, vector<8x1xf32>
    %77 = arith.index_cast %72 : i32 to index
    %c0_24 = arith.constant 0 : index
    %78 = vector.load %arg4[%77, %c0_24] : memref<72x1xf32, #tpu.memory_space<vmem>>, vector<8x1xf32>
    %79 = vector.broadcast %74 : vector<8x1xf32> to vector<8x128xf32>
    %80 = vector.broadcast %0 : vector<1x128xf32> to vector<8x128xf32>
    %81 = arith.mulf %79, %80 : vector<8x128xf32>
    %82 = vector.broadcast %76 : vector<8x1xf32> to vector<8x128xf32>
    %83 = arith.addf %81, %82 : vector<8x128xf32>
    %cst_25 = arith.constant 5.000000e-01 : f32
    %84 = vector.broadcast %cst_25 : f32 to vector<8x128xf32>
    %85 = arith.mulf %84, %83 : vector<8x128xf32>
    %86 = math.tanh %85 : vector<8x128xf32>
    %cst_26 = arith.constant 5.000000e-01 : f32
    %87 = vector.broadcast %cst_26 : f32 to vector<8x128xf32>
    %88 = arith.mulf %87, %86 : vector<8x128xf32>
    %cst_27 = arith.constant 5.000000e-01 : f32
    %89 = vector.broadcast %cst_27 : f32 to vector<8x128xf32>
    %90 = arith.addf %88, %89 : vector<8x128xf32>
    %91 = vector.broadcast %78 : vector<8x1xf32> to vector<8x128xf32>
    %92 = arith.mulf %91, %90 : vector<8x128xf32>
    %93 = arith.addf %70, %92 : vector<8x128xf32>
    %c4_i32 = arith.constant 4 : i32
    %c8_i32_28 = arith.constant 8 : i32
    %94 = arith.muli %c4_i32, %c8_i32_28 : i32
    %95 = tpu.assume_multiple %94, 8 : i32
    %96 = arith.index_cast %95 : i32 to index
    %c0_29 = arith.constant 0 : index
    %97 = vector.load %arg2[%96, %c0_29] : memref<72x1xf32, #tpu.memory_space<vmem>>, vector<8x1xf32>
    %98 = arith.index_cast %95 : i32 to index
    %c0_30 = arith.constant 0 : index
    %99 = vector.load %arg3[%98, %c0_30] : memref<72x1xf32, #tpu.memory_space<vmem>>, vector<8x1xf32>
    %100 = arith.index_cast %95 : i32 to index
    %c0_31 = arith.constant 0 : index
    %101 = vector.load %arg4[%100, %c0_31] : memref<72x1xf32, #tpu.memory_space<vmem>>, vector<8x1xf32>
    %102 = vector.broadcast %97 : vector<8x1xf32> to vector<8x128xf32>
    %103 = vector.broadcast %0 : vector<1x128xf32> to vector<8x128xf32>
    %104 = arith.mulf %102, %103 : vector<8x128xf32>
    %105 = vector.broadcast %99 : vector<8x1xf32> to vector<8x128xf32>
    %106 = arith.addf %104, %105 : vector<8x128xf32>
    %cst_32 = arith.constant 5.000000e-01 : f32
    %107 = vector.broadcast %cst_32 : f32 to vector<8x128xf32>
    %108 = arith.mulf %107, %106 : vector<8x128xf32>
    %109 = math.tanh %108 : vector<8x128xf32>
    %cst_33 = arith.constant 5.000000e-01 : f32
    %110 = vector.broadcast %cst_33 : f32 to vector<8x128xf32>
    %111 = arith.mulf %110, %109 : vector<8x128xf32>
    %cst_34 = arith.constant 5.000000e-01 : f32
    %112 = vector.broadcast %cst_34 : f32 to vector<8x128xf32>
    %113 = arith.addf %111, %112 : vector<8x128xf32>
    %114 = vector.broadcast %101 : vector<8x1xf32> to vector<8x128xf32>
    %115 = arith.mulf %114, %113 : vector<8x128xf32>
    %116 = arith.addf %93, %115 : vector<8x128xf32>
    %c5_i32 = arith.constant 5 : i32
    %c8_i32_35 = arith.constant 8 : i32
    %117 = arith.muli %c5_i32, %c8_i32_35 : i32
    %118 = tpu.assume_multiple %117, 8 : i32
    %119 = arith.index_cast %118 : i32 to index
    %c0_36 = arith.constant 0 : index
    %120 = vector.load %arg2[%119, %c0_36] : memref<72x1xf32, #tpu.memory_space<vmem>>, vector<8x1xf32>
    %121 = arith.index_cast %118 : i32 to index
    %c0_37 = arith.constant 0 : index
    %122 = vector.load %arg3[%121, %c0_37] : memref<72x1xf32, #tpu.memory_space<vmem>>, vector<8x1xf32>
    %123 = arith.index_cast %118 : i32 to index
    %c0_38 = arith.constant 0 : index
    %124 = vector.load %arg4[%123, %c0_38] : memref<72x1xf32, #tpu.memory_space<vmem>>, vector<8x1xf32>
    %125 = vector.broadcast %120 : vector<8x1xf32> to vector<8x128xf32>
    %126 = vector.broadcast %0 : vector<1x128xf32> to vector<8x128xf32>
    %127 = arith.mulf %125, %126 : vector<8x128xf32>
    %128 = vector.broadcast %122 : vector<8x1xf32> to vector<8x128xf32>
    %129 = arith.addf %127, %128 : vector<8x128xf32>
    %cst_39 = arith.constant 5.000000e-01 : f32
    %130 = vector.broadcast %cst_39 : f32 to vector<8x128xf32>
    %131 = arith.mulf %130, %129 : vector<8x128xf32>
    %132 = math.tanh %131 : vector<8x128xf32>
    %cst_40 = arith.constant 5.000000e-01 : f32
    %133 = vector.broadcast %cst_40 : f32 to vector<8x128xf32>
    %134 = arith.mulf %133, %132 : vector<8x128xf32>
    %cst_41 = arith.constant 5.000000e-01 : f32
    %135 = vector.broadcast %cst_41 : f32 to vector<8x128xf32>
    %136 = arith.addf %134, %135 : vector<8x128xf32>
    %137 = vector.broadcast %124 : vector<8x1xf32> to vector<8x128xf32>
    %138 = arith.mulf %137, %136 : vector<8x128xf32>
    %139 = arith.addf %116, %138 : vector<8x128xf32>
    %c6_i32 = arith.constant 6 : i32
    %c8_i32_42 = arith.constant 8 : i32
    %140 = arith.muli %c6_i32, %c8_i32_42 : i32
    %141 = tpu.assume_multiple %140, 8 : i32
    %142 = arith.index_cast %141 : i32 to index
    %c0_43 = arith.constant 0 : index
    %143 = vector.load %arg2[%142, %c0_43] : memref<72x1xf32, #tpu.memory_space<vmem>>, vector<8x1xf32>
    %144 = arith.index_cast %141 : i32 to index
    %c0_44 = arith.constant 0 : index
    %145 = vector.load %arg3[%144, %c0_44] : memref<72x1xf32, #tpu.memory_space<vmem>>, vector<8x1xf32>
    %146 = arith.index_cast %141 : i32 to index
    %c0_45 = arith.constant 0 : index
    %147 = vector.load %arg4[%146, %c0_45] : memref<72x1xf32, #tpu.memory_space<vmem>>, vector<8x1xf32>
    %148 = vector.broadcast %143 : vector<8x1xf32> to vector<8x128xf32>
    %149 = vector.broadcast %0 : vector<1x128xf32> to vector<8x128xf32>
    %150 = arith.mulf %148, %149 : vector<8x128xf32>
    %151 = vector.broadcast %145 : vector<8x1xf32> to vector<8x128xf32>
    %152 = arith.addf %150, %151 : vector<8x128xf32>
    %cst_46 = arith.constant 5.000000e-01 : f32
    %153 = vector.broadcast %cst_46 : f32 to vector<8x128xf32>
    %154 = arith.mulf %153, %152 : vector<8x128xf32>
    %155 = math.tanh %154 : vector<8x128xf32>
    %cst_47 = arith.constant 5.000000e-01 : f32
    %156 = vector.broadcast %cst_47 : f32 to vector<8x128xf32>
    %157 = arith.mulf %156, %155 : vector<8x128xf32>
    %cst_48 = arith.constant 5.000000e-01 : f32
    %158 = vector.broadcast %cst_48 : f32 to vector<8x128xf32>
    %159 = arith.addf %157, %158 : vector<8x128xf32>
    %160 = vector.broadcast %147 : vector<8x1xf32> to vector<8x128xf32>
    %161 = arith.mulf %160, %159 : vector<8x128xf32>
    %162 = arith.addf %139, %161 : vector<8x128xf32>
    %c7_i32 = arith.constant 7 : i32
    %c8_i32_49 = arith.constant 8 : i32
    %163 = arith.muli %c7_i32, %c8_i32_49 : i32
    %164 = tpu.assume_multiple %163, 8 : i32
    %165 = arith.index_cast %164 : i32 to index
    %c0_50 = arith.constant 0 : index
    %166 = vector.load %arg2[%165, %c0_50] : memref<72x1xf32, #tpu.memory_space<vmem>>, vector<8x1xf32>
    %167 = arith.index_cast %164 : i32 to index
    %c0_51 = arith.constant 0 : index
    %168 = vector.load %arg3[%167, %c0_51] : memref<72x1xf32, #tpu.memory_space<vmem>>, vector<8x1xf32>
    %169 = arith.index_cast %164 : i32 to index
    %c0_52 = arith.constant 0 : index
    %170 = vector.load %arg4[%169, %c0_52] : memref<72x1xf32, #tpu.memory_space<vmem>>, vector<8x1xf32>
    %171 = vector.broadcast %166 : vector<8x1xf32> to vector<8x128xf32>
    %172 = vector.broadcast %0 : vector<1x128xf32> to vector<8x128xf32>
    %173 = arith.mulf %171, %172 : vector<8x128xf32>
    %174 = vector.broadcast %168 : vector<8x1xf32> to vector<8x128xf32>
    %175 = arith.addf %173, %174 : vector<8x128xf32>
    %cst_53 = arith.constant 5.000000e-01 : f32
    %176 = vector.broadcast %cst_53 : f32 to vector<8x128xf32>
    %177 = arith.mulf %176, %175 : vector<8x128xf32>
    %178 = math.tanh %177 : vector<8x128xf32>
    %cst_54 = arith.constant 5.000000e-01 : f32
    %179 = vector.broadcast %cst_54 : f32 to vector<8x128xf32>
    %180 = arith.mulf %179, %178 : vector<8x128xf32>
    %cst_55 = arith.constant 5.000000e-01 : f32
    %181 = vector.broadcast %cst_55 : f32 to vector<8x128xf32>
    %182 = arith.addf %180, %181 : vector<8x128xf32>
    %183 = vector.broadcast %170 : vector<8x1xf32> to vector<8x128xf32>
    %184 = arith.mulf %183, %182 : vector<8x128xf32>
    %185 = arith.addf %162, %184 : vector<8x128xf32>
    %c8_i32_56 = arith.constant 8 : i32
    %c8_i32_57 = arith.constant 8 : i32
    %186 = arith.muli %c8_i32_56, %c8_i32_57 : i32
    %187 = tpu.assume_multiple %186, 8 : i32
    %188 = arith.index_cast %187 : i32 to index
    %c0_58 = arith.constant 0 : index
    %189 = vector.load %arg2[%188, %c0_58] : memref<72x1xf32, #tpu.memory_space<vmem>>, vector<8x1xf32>
    %190 = arith.index_cast %187 : i32 to index
    %c0_59 = arith.constant 0 : index
    %191 = vector.load %arg3[%190, %c0_59] : memref<72x1xf32, #tpu.memory_space<vmem>>, vector<8x1xf32>
    %192 = arith.index_cast %187 : i32 to index
    %c0_60 = arith.constant 0 : index
    %193 = vector.load %arg4[%192, %c0_60] : memref<72x1xf32, #tpu.memory_space<vmem>>, vector<8x1xf32>
    %194 = vector.broadcast %189 : vector<8x1xf32> to vector<8x128xf32>
    %195 = vector.broadcast %0 : vector<1x128xf32> to vector<8x128xf32>
    %196 = arith.mulf %194, %195 : vector<8x128xf32>
    %197 = vector.broadcast %191 : vector<8x1xf32> to vector<8x128xf32>
    %198 = arith.addf %196, %197 : vector<8x128xf32>
    %cst_61 = arith.constant 5.000000e-01 : f32
    %199 = vector.broadcast %cst_61 : f32 to vector<8x128xf32>
    %200 = arith.mulf %199, %198 : vector<8x128xf32>
    %201 = math.tanh %200 : vector<8x128xf32>
    %cst_62 = arith.constant 5.000000e-01 : f32
    %202 = vector.broadcast %cst_62 : f32 to vector<8x128xf32>
    %203 = arith.mulf %202, %201 : vector<8x128xf32>
    %cst_63 = arith.constant 5.000000e-01 : f32
    %204 = vector.broadcast %cst_63 : f32 to vector<8x128xf32>
    %205 = arith.addf %203, %204 : vector<8x128xf32>
    %206 = vector.broadcast %193 : vector<8x1xf32> to vector<8x128xf32>
    %207 = arith.mulf %206, %205 : vector<8x128xf32>
    %208 = arith.addf %185, %207 : vector<8x128xf32>
    %c9_i32 = arith.constant 9 : i32
    %cst_64 = arith.constant dense<0.000000e+00> : vector<128xf32>
    %209 = vector.multi_reduction <add>, %208, %cst_64 [0] : vector<8x128xf32> to vector<128xf32>
    %210 = vector.shape_cast %209 : vector<128xf32> to vector<1x128xf32>
    %c0_65 = arith.constant 0 : index
    %c0_66 = arith.constant 0 : index
    %211 = memref.load %arg5[%c0_65, %c0_66] : memref<1x1xf32, #tpu.memory_space<smem>>
    %212 = vector.broadcast %211 : f32 to vector<1x128xf32>
    %213 = arith.addf %210, %212 : vector<1x128xf32>
    %c0_67 = arith.constant 0 : index
    %c0_68 = arith.constant 0 : index
    %214 = vector.load %arg6[%c0_67, %c0_68] : memref<1x128xf32, #tpu.memory_space<vmem>>, vector<1x128xf32>
    tpu.vector_store %arg6[%c0_67, %c0_68], %213 {strides = array<i32>} : memref<1x128xf32, #tpu.memory_space<vmem>>, vector<1x128xf32>,
    return
  }
  func.func @transform_0(%arg0: i32) -> (i32, i32) {
    %c0_i32 = arith.constant 0 : i32
    %c0_i32_0 = arith.constant 0 : i32
    return %c0_i32, %arg0 : i32, i32
  }
  func.func @transform_1(%arg0: i32) -> (i32, i32) {
    %c0_i32 = arith.constant 0 : i32
    %c0_i32_0 = arith.constant 0 : i32
    %c0_i32_1 = arith.constant 0 : i32
    return %c0_i32, %c0_i32_0 : i32, i32
  }
  func.func @transform_2(%arg0: i32) -> (i32, i32) {
    %c0_i32 = arith.constant 0 : i32
    %c0_i32_0 = arith.constant 0 : i32
    %c0_i32_1 = arith.constant 0 : i32
    return %c0_i32, %c0_i32_0 : i32, i32
  }
  func.func @transform_3(%arg0: i32) -> (i32, i32) {
    %c0_i32 = arith.constant 0 : i32
    %c0_i32_0 = arith.constant 0 : i32
    %c0_i32_1 = arith.constant 0 : i32
    return %c0_i32, %c0_i32_0 : i32, i32
  }
  func.func @transform_4(%arg0: i32) -> (i32, i32) {
    %c0_i32 = arith.constant 0 : i32
    %c0_i32_0 = arith.constant 0 : i32
    %c0_i32_1 = arith.constant 0 : i32
    return %c0_i32, %c0_i32_0 : i32, i32
  }
  func.func @transform_5(%arg0: i32) -> (i32, i32) {
    %c0_i32 = arith.constant 0 : i32
    %c0_i32_0 = arith.constant 0 : i32
    return %c0_i32, %arg0 : i32, i32
  }
}

</mosaic_0001>

<bundles_post_ra>
// kernel: tpu_custom_call.1
= control target key start
LH: loop header
LB: loop body
LE: loop exit
PB: predicated region body
PF: predicated region fallthrough
CT: control target
= control target key end

     0   :  { %v382_v2 = vmov 0   ;;  %s513_s0 = inlined_call_operand.vmem [shape: f32[1,128], index: 0, kind: input, shape index: {}]   ;;  %s514_s1 = inlined_call_operand.vmem [shape: f32[72,1], index: 1, kind: input, shape index: {}]   ;;  %s515_s2 = inlined_call_operand.vmem [shape: f32[72,1], index: 2, kind: input, shape index: {}]   ;;  %s516_s3 = inlined_call_operand.vmem [shape: f32[72,1], index: 3, kind: input, shape index: {}]   ;;  %s517_s4 = inlined_call_operand.<no memory space> [shape: f32[1,1], index: 4, kind: input, shape index: {}]   ;;  %s518_s5 = inlined_call_operand.hbm [shape: f32[1,128], index: 5, kind: output, shape index: {}]  }
   0x1   :  { %v24_v0 = vld [vmem:[%s515_s2] sm:$0xff]  ;;  %339 = vset.pattern.permute.xlu1 %v382_v2  ;;  %338 = vset.pattern.permute.xlu0 %v382_v2  ;;  %v313_v3 = vld [vmem:[%s515_s2 + $0x8] sm:$0xff]  ;;  %v316_v5 = vld [vmem:[%s515_s2 + $0x10] sm:$0xff] }
   0x2   :  { %v23_v1 = vld [vmem:[%s514_s1] sm:$0xff]  ;;  %40 = vperm.xlu1 %339, %v24_v0   ;;  %v312_v4 = vld [vmem:[%s514_s1 + $0x8] sm:$0xff]  ;;  %v315_v6 = vld [vmem:[%s514_s1 + $0x10] sm:$0xff] }
   0x3   :  { %28 = vperm.xlu0 %338, %v23_v1  }
   0x6   :  { %69 = vperm.xlu1 %339, %v313_v3  }
   0x7   :  { %63 = vperm.xlu0 %338, %v312_v4  }
   0x8   :  { %11 = vsyncpa [#allocation4], 0  ;;  %v319_v7 = vld [vmem:[%s515_s2 + $0x18] sm:$0xff]  ;;  %v322_v9 = vld [vmem:[%s515_s2 + $0x20] sm:$0xff]  ;;  %s383_s22 = smov [#allocation3]  }
   0x9   :  { %v318_v8 = vld [vmem:[%s514_s1 + $0x18] sm:$0xff]  ;;  %v321_v10 = vld [vmem:[%s514_s1 + $0x20] sm:$0xff]  ;;  %v325_v11 = vld [vmem:[%s515_s2 + $0x28] sm:$0xff]  ;;  %s303_s23 = sshll.u32 %s383_s22, 4  ;;  %s304_s23 = int_to_ptr.vmem [resolvable:$true] %s303_s23 }
   0xa   :  { %98 = vperm.xlu1 %339, %v316_v5   ;;  %v324_v12 = vld [vmem:[%s514_s1 + $0x28] sm:$0xff]  ;;  %v328_v13 = vld [vmem:[%s515_s2 + $0x30] sm:$0xff]  ;;  %v331_v15 = vld [vmem:[%s515_s2 + $0x38] sm:$0xff]  ;;  %s358_s24 = scalar_lea.vmem %s304_s23, 16  ;;  %s362_s25 = scalar_lea.vmem %s304_s23, 32 }
   0xb   :  { %92 = vperm.xlu0 %338, %v315_v6   ;;  %v327_v14 = vld [vmem:[%s514_s1 + $0x30] sm:$0xff]  ;;  %v330_v16 = vld [vmem:[%s514_s1 + $0x38] sm:$0xff]  ;;  %v334_v17 = vld [vmem:[%s515_s2 + $0x40] sm:$0xff]  ;;  %p359_p0 = scmp.ne.s32.totalorder %s304_s23, %s358_s24  ;;  %p363_p1 = scmp.lt.s32.totalorder %s304_s23, %s304_s23 }
   0xc   :  { %v333_v18 = vld [vmem:[%s514_s1 + $0x40] sm:$0xff]  ;;  %v314_v19 = vld [vmem:[%s516_s3 + $0x8] sm:$0xff]  ;;  %v320_v21 = vld [vmem:[%s516_s3 + $0x18] sm:$0xff]  ;;  %p364_p2 = scmp.lt.s32.totalorder %s362_s25, %s358_s24 }
   0xd   :  { %v25_v20 = vld [vmem:[%s516_s3] sm:$0xff]  ;;  %v317_v22 = vld [vmem:[%s516_s3 + $0x10] sm:$0xff]  ;;  %v326_v23 = vld [vmem:[%s516_s3 + $0x28] sm:$0xff] }
   0xe   :  { %127 = vperm.xlu1 %339, %v319_v7   ;;  %v323_v24 = vld [vmem:[%s516_s3 + $0x20] sm:$0xff]  ;;  %v332_v25 = vld [vmem:[%s516_s3 + $0x38] sm:$0xff]  ;;  %v329_v26 = vld [vmem:[%s516_s3 + $0x30] sm:$0xff]  ;;  %p365_p3 = por %p364_p2, %p363_p1 }
   0xf   :  { %121 = vperm.xlu0 %338, %v318_v8   ;;  %v335_v27 = vld [vmem:[%s516_s3 + $0x40] sm:$0xff] }
  0x10   :  { %v311_v30 = vld [vmem:[%s513_s0] ss:$0 sm:$0xff]  ;;  %p366_p4 = pnand %p365_p3, %p359_p0 }
  0x12   :  { %156 = vperm.xlu1 %339, %v322_v9  }
  0x13   :  { %150 = vperm.xlu0 %338, %v321_v10  }
  0x16   :  { %185 = vperm.xlu1 %339, %v325_v11  }
  0x17   :  { %179 = vperm.xlu0 %338, %v324_v12  }
  0x1a   :  { %214 = vperm.xlu1 %339, %v328_v13  }
  0x1b   :  { %208 = vperm.xlu0 %338, %v327_v14  }
  0x1e   :  { %243 = vperm.xlu1 %339, %v331_v15  }
  0x1f   :  { %237 = vperm.xlu0 %338, %v330_v16  }
  0x22   :  { %272 = vperm.xlu1 %339, %v334_v17  }
  0x23   :  { %266 = vperm.xlu0 %338, %v333_v18  }
  0x26   :  { %79 = vperm.xlu1 %339, %v314_v19  }
  0x27   :  { %50 = vperm.xlu0 %338, %v25_v20  }
  0x2a   :  { %137 = vperm.xlu1 %339, %v320_v21  }
  0x2b   :  { %108 = vperm.xlu0 %338, %v317_v22  }
  0x2e   :  { %195 = vperm.xlu1 %339, %v326_v23  }
  0x2f   :  { %166 = vperm.xlu0 %338, %v323_v24  }
  0x32   :  { %253 = vperm.xlu1 %339, %v332_v25  }
  0x33   :  { %224 = vperm.xlu0 %338, %v329_v26  }
  0x37   :  { %282 = vperm.xlu0 %338, %v335_v27  }
  0x81   :  { %v41_v28 = vpop.permute.xlu1 %40 }
  0x82   :  { %v29_v29 = vpop.permute.xlu0 %28 }
  0x83   :  { %v37_v33 = vmul.f32 %v311_v30, %v29_v29 }
  0x85   :  { %v70_v31 = vpop.permute.xlu1 %69  ;;  %v43_v37 = vadd.f32 %v41_v28, %v37_v33 }
  0x86   :  { %v64_v32 = vpop.permute.xlu0 %63 }
  0x87   :  { %v66_v34 = vmul.f32 %v311_v30, %v64_v32  ;;  %v44_v42 = vmul.f32 0.5, %v43_v37 }
  0x89   :  { %v99_v35 = vpop.permute.xlu1 %98  ;;  %v72_v38 = vadd.f32 %v70_v31, %v66_v34  ;;  %340 = vtanh.f32 %v44_v42 }
  0x8a   :  { %v93_v36 = vpop.permute.xlu0 %92 }
  0x8b   :  { %v95_v39 = vmul.f32 %v311_v30, %v93_v36  ;;  %v73_v44 = vmul.f32 0.5, %v72_v38 }
  0x8d   :  { %v128_v40 = vpop.permute.xlu1 %127  ;;  %v101_v45 = vadd.f32 %v99_v35, %v95_v39  ;;  %342 = vtanh.f32 %v73_v44 }
  0x8e   :  { %v122_v41 = vpop.permute.xlu0 %121 }
  0x8f   :  { %v124_v43 = vmul.f32 %v311_v30, %v122_v41  ;;  %v102_v50 = vmul.f32 0.5, %v101_v45 }
  0x91   :  { %v130_v46 = vadd.f32 %v128_v40, %v124_v43  ;;  %v157_v47 = vpop.permute.xlu1 %156  ;;  %344 = vtanh.f32 %v102_v50 }
  0x92   :  { %v151_v48 = vpop.permute.xlu0 %150 }
  0x93   :  { %v153_v49 = vmul.f32 %v311_v30, %v151_v48  ;;  %v131_v52 = vmul.f32 0.5, %v130_v46  ;;  %v341_v62 = vpop.eup %340 }
  0x94   :  { %v46_v5 = vmul.f32 0.5, %v341_v62 }
  0x95   :  { %v159_v51 = vadd.f32 %v157_v47, %v153_v49  ;;  %v186_v53 = vpop.permute.xlu1 %185  ;;  %346 = vtanh.f32 %v131_v52 }
  0x96   :  { %v180_v54 = vpop.permute.xlu0 %179  ;;  %v47_v14 = vadd.f32 0.5, %v46_v5 }
  0x97   :  { %v182_v55 = vmul.f32 %v311_v30, %v180_v54  ;;  %v160_v56 = vmul.f32 0.5, %v159_v51  ;;  %v343_v0 = vpop.eup %342 }
  0x98   :  { %v75_v7 = vmul.f32 0.5, %v343_v0 }
  0x99   :  { %v188_v57 = vadd.f32 %v186_v53, %v182_v55  ;;  %v215_v58 = vpop.permute.xlu1 %214  ;;  %348 = vtanh.f32 %v160_v56 }
  0x9a   :  { %v209_v59 = vpop.permute.xlu0 %208  ;;  %v76_v16 = vadd.f32 0.5, %v75_v7 }
  0x9b   :  { %v189_v60 = vmul.f32 0.5, %v188_v57  ;;  %v211_v61 = vmul.f32 %v311_v30, %v209_v59  ;;  %v345_v8 = vpop.eup %344 }
  0x9c   :  { %v104_v17 = vmul.f32 0.5, %v345_v8 }
  0x9d   :  { %v217_v63 = vadd.f32 %v215_v58, %v211_v61  ;;  %350 = vtanh.f32 %v189_v60  ;;  %v244_v1 = vpop.permute.xlu1 %243 }
  0x9e   :  { %v238_v2 = vpop.permute.xlu0 %237  ;;  %v105_v26 = vadd.f32 0.5, %v104_v17 }
  0x9f   :  { %v218_v3 = vmul.f32 0.5, %v217_v63  ;;  %v240_v4 = vmul.f32 %v311_v30, %v238_v2  ;;  %v347_v13 = vpop.eup %346 }
  0xa0   :  { %v133_v24 = vmul.f32 0.5, %v347_v13 }
  0xa1   :  { %352 = vtanh.f32 %v218_v3  ;;  %v246_v6 = vadd.f32 %v244_v1, %v240_v4  ;;  %v273_v9 = vpop.permute.xlu1 %272  ;;  %v294_v4 = vstv %s517_s4 }
  0xa2   :  { %v267_v10 = vpop.permute.xlu0 %266  ;;  %v134_v32 = vadd.f32 0.5, %v133_v24 }
  0xa3   :  { %v247_v11 = vmul.f32 0.5, %v246_v6  ;;  %v269_v12 = vmul.f32 %v311_v30, %v267_v10  ;;  %v349_v18 = vpop.eup %348 }
  0xa4   :  { %v162_v27 = vmul.f32 0.5, %v349_v18 }
  0xa5   :  { %354 = vtanh.f32 %v247_v11  ;;  %v275_v15 = vadd.f32 %v273_v9, %v269_v12  ;;  %v80_v19 = vpop.permute.xlu1 %79 }
  0xa6   :  { %v51_v20 = vpop.permute.xlu0 %50  ;;  %v82_v22 = vmul.f32 %v80_v19, %v76_v16  ;;  %v163_v37 = vadd.f32 0.5, %v162_v27 }
  0xa7   :  { %v276_v21 = vmul.f32 0.5, %v275_v15  ;;  %v53_v23 = vmul.f32 %v51_v20, %v47_v14  ;;  %v351_v25 = vpop.eup %350 }
  0xa8   :  { %v191_v34 = vmul.f32 0.5, %v351_v25 }
  0xa9   :  { %356 = vtanh.f32 %v276_v21  ;;  %v138_v28 = vpop.permute.xlu1 %137  ;;  %v83_v31 = vadd.f32 %v82_v22, %v53_v23 }
  0xaa   :  { %v109_v29 = vpop.permute.xlu0 %108  ;;  %v140_v35 = vmul.f32 %v138_v28, %v134_v32  ;;  %v192_v42 = vadd.f32 0.5, %v191_v34 }
  0xab   :  { %v353_v30 = vpop.eup %352  ;;  %v111_v33 = vmul.f32 %v109_v29, %v105_v26 }
  0xac   :  { %v220_v38 = vmul.f32 0.5, %v353_v30 }
  0xad   :  { %v112_v36 = vadd.f32 %v111_v33, %v83_v31  ;;  %v196_v39 = vpop.permute.xlu1 %195 }
  0xae   :  { %v167_v40 = vpop.permute.xlu0 %166  ;;  %v198_v46 = vmul.f32 %v196_v39, %v192_v42  ;;  %v221_v48 = vadd.f32 0.5, %v220_v38 }
  0xaf   :  { %v355_v41 = vpop.eup %354  ;;  %v141_v43 = vadd.f32 %v140_v35, %v112_v36  ;;  %v169_v44 = vmul.f32 %v167_v40, %v163_v37 }
  0xb0   :  { %v249_v45 = vmul.f32 0.5, %v355_v41 }
  0xb1   :  { %v170_v47 = vadd.f32 %v169_v44, %v141_v43  ;;  %v254_v49 = vpop.permute.xlu1 %253 }
  0xb2   :  { %v250_v50 = vadd.f32 0.5, %v249_v45  ;;  %v225_v51 = vpop.permute.xlu0 %224 }
  0xb3   :  { %v357_v52 = vpop.eup %356  ;;  %v199_v53 = vadd.f32 %v198_v46, %v170_v47  ;;  %v227_v54 = vmul.f32 %v225_v51, %v221_v48 }
  0xb4   :  { %v256_v55 = vmul.f32 %v254_v49, %v250_v50  ;;  %v278_v56 = vmul.f32 0.5, %v357_v52 }
  0xb5   :  { %v228_v57 = vadd.f32 %v227_v54, %v199_v53 }
  0xb6   :  { %v283_v58 = vpop.permute.xlu0 %282  ;;  %v279_v59 = vadd.f32 0.5, %v278_v56 }
  0xb7   :  { %v257_v60 = vadd.f32 %v256_v55, %v228_v57 }
  0xb8   :  { %v285_v61 = vmul.f32 %v283_v58, %v279_v59 }
  0xba   :  { %v286_v62 = vadd.f32 %v285_v61, %v257_v60 }
  0xbc   :  { %v287_v63 = vrot.slane %v286_v62, 4 }
  0xbe   :  { %v288_v0 = vadd.f32 %v287_v63, %v286_v62 }
  0xc0   :  { %v289_v1 = vrot.slane %v288_v0, 2 }
  0xc2   :  { %v290_v2 = vadd.f32 %v289_v1, %v288_v0 }
  0xc4   :  { %v291_v3 = vrot.slane %v290_v2, 1 }
  0xc6   :  { %v292_v5 = vadd.f32 %v291_v3, %v290_v2 }
  0xc8   :  { %v295_v6 = vadd.f32 %v294_v4, %v292_v5 }
  0xca   :  { %296 = vst [vmem:[#allocation3] sm:$0x1] %v295_v6 }
  0xcb   :  { %369 = shalt.err (!%p366_p4)
}
  0xcc   :  { %s370_s28 = scalar_lea.hbm %s518_s5, 16 }
  0xcd   :  { %p371_p5 = scmp.ne.s32.totalorder %s518_s5, %s370_s28  ;;  %p374_p6 = scmp.lt.u32.totalorder %s370_s28, %s518_s5 }
  0xcf   :  { %p376_p7 = pnand %p374_p6, %p371_p5 }
  0xd1   :  { %379 = shalt.err (!%p376_p7)
}
  0xd2   :  { %306 = dma.vmem_to_hbm [thread:$0]  %s304_s23, 16, %s518_s5, [#allocation4]  }
  0xd3   :  { %380 = dma.done.wait [#allocation4], 16  }
  0xd4   :  { %381 = vsyncadd [#allocation4], 4294967280 }
  0xd5   :  { %310 = vsyncpa [#allocation4], 1 }

</bundles_post_ra>
